<compile_context>
chip_gen: v5e
topology: v5e:2x2
jax: 0.10.0
libtpu: 0.0.40
codegen_flags: <defaults>
</compile_context>

<pallas_src>
import jax
import jax.numpy as jnp
from jax.experimental import pallas as pl
from jax.experimental.pallas import tpu as pltpu


def mlp_forward_kernel(x_ref, w1_ref, b1_ref, w2_ref, b2_ref, o_ref):
    # hidden = relu(x @ W1 + b1)   — f32 MXU feed, f32 accumulation/epilogue.
    h = jnp.dot(x_ref[...], w1_ref[...], preferred_element_type=jnp.float32)
    h = jnp.maximum(h + b1_ref[...], 0.0)
    # out = hidden @ W2 + b2       — f32 throughout (torch.nn.Linear semantics).
    out = jnp.dot(h, w2_ref[...], preferred_element_type=jnp.float32)
    o_ref[...] = (out + b2_ref[...]).astype(o_ref.dtype)


def mlp_forward(x, w1, b1, w2, b2, *, block_b=None):
    """Fused MLP forward (network inside `Model`).

    x  : (B, D_in)   float32
    w1 : (D_in, H)   float32 (pre-transposed vs. torch Linear weight)
    b1 : (1, H)      float32
    w2 : (H, D_out)  float32
    b2 : (1, D_out)  float32
    Returns (B, D_out) float32 — identical semantics to
    relu(x @ w1 + b1) @ w2 + b2.
    """
    B, D_in = x.shape
    D_in_w, H = w1.shape
    H_w, D_out = w2.shape
    assert D_in == D_in_w and H == H_w
    assert b1.shape == (1, H) and b2.shape == (1, D_out)

    # Default: one grid step holding the whole batch (launch-bound regime on
    # every TPU generation at these sizes).  Larger batches can tile.
    if block_b is None or block_b >= B:
        block_b = B
    assert B % block_b == 0, "block_b must divide B"
    assert block_b == B or block_b % 8 == 0, "batch tile must be sublane-aligned"
    nb = B // block_b

    flops = 2 * B * (D_in * H + H * D_out)
    bytes_accessed = 4 * (x.size + w1.size + b1.size + w2.size + b2.size
                          + B * D_out)

    return pl.pallas_call(
        mlp_forward_kernel,
        out_shape=jax.ShapeDtypeStruct((B, D_out), x.dtype),
        grid=(nb,),
        in_specs=[
            pl.BlockSpec((block_b, D_in), lambda i: (i, 0)),  # x batch tile
            pl.BlockSpec((D_in, H), lambda i: (0, 0)),        # W1 resident
            pl.BlockSpec((1, H), lambda i: (0, 0)),           # b1 resident
            pl.BlockSpec((H, D_out), lambda i: (0, 0)),       # W2 resident
            pl.BlockSpec((1, D_out), lambda i: (0, 0)),       # b2 resident
        ],
        out_specs=pl.BlockSpec((block_b, D_out), lambda i: (i, 0)),
        compiler_params=pltpu.CompilerParams(
            dimension_semantics=("parallel",)),
        cost_estimate=pl.CostEstimate(
            flops=flops, transcendentals=0, bytes_accessed=bytes_accessed),
    )(x, w1, b1, w2, b2)


if __name__ == "__main__":
    # Logical network shapes implied by a small classification net wrapped by
    # Model: in_features=32, hidden=64, num_classes=16, batch 256.
    B, D_in, H, D_out = 256, 32, 64, 16

    key = jax.random.PRNGKey(0)
    kx, kw1, kb1, kw2, kb2 = jax.random.split(key, 5)

    # "Model init": weights are created once, in their natural f32 shapes —
    # there is no per-forward padding/cast work left to hoist.
    x = jax.random.normal(kx, (B, D_in), dtype=jnp.float32)
    w1 = jax.random.normal(kw1, (D_in, H), dtype=jnp.float32) * (1.0 / jnp.sqrt(D_in))
    b1 = jax.random.normal(kb1, (1, H), dtype=jnp.float32) * 0.01
    w2 = jax.random.normal(kw2, (H, D_out), dtype=jnp.float32) * (1.0 / jnp.sqrt(H))
    b2 = jax.random.normal(kb2, (1, D_out), dtype=jnp.float32) * 0.01

    out = mlp_forward(x, w1, b1, w2, b2)
    out = jax.block_until_ready(out)

    # True float32 torch.nn.Linear reference (no bf16 mirroring of the kernel):
    # the kernel now computes in f32, so it is validated against real
    # Model.forward semantics.
    ref = jnp.maximum(x @ w1 + b1, 0.0) @ w2 + b2

    assert out.shape == (B, D_out)
    max_err = float(jnp.max(jnp.abs(out - ref)))
    assert jnp.allclose(out, ref, atol=2e-2, rtol=2e-2), max_err

    # TODO(synk): the training-loop machinery (fit/evaluate/fit_ddp, Accelerator,
    # optimizer, loss/metric bookkeeping, checkpointing, tqdm logging) is
    # host-side orchestration with no Pallas equivalent; only the forward pass
    # (Model.forward -> network.forward) is implemented as a kernel.
    print("KERNEL_OK")
</pallas_src>

<mosaic_0001>
module attributes {stable_mosaic.version = 11 : i64} {
  func.func @mlp_forward_kernel(%arg0: i32, %arg1: memref<256x32xf32, #tpu.memory_space<vmem>>, %arg2: memref<32x64xf32, #tpu.memory_space<vmem>>, %arg3: memref<1x64xf32, #tpu.memory_space<vmem>>, %arg4: memref<64x16xf32, #tpu.memory_space<vmem>>, %arg5: memref<1x16xf32, #tpu.memory_space<vmem>>, %arg6: memref<256x16xf32, #tpu.memory_space<vmem>>) attributes {dimension_semantics = [#tpu.dimension_semantics<parallel>], iteration_bounds = array<i64: 1>, scalar_prefetch = 0 : i64, scratch_operands = 0 : i64, tpu.core_type = #tpu.core_type<tc>, window_params = [{transform_indices = @transform_0, window_bounds = array<i64: 256, 32>}, {pipeline_mode = #tpu.pipeline_mode<synchronous>, transform_indices = @transform_1, window_bounds = array<i64: 32, 64>}, {pipeline_mode = #tpu.pipeline_mode<synchronous>, transform_indices = @transform_2, window_bounds = array<i64: 1, 64>}, {pipeline_mode = #tpu.pipeline_mode<synchronous>, transform_indices = @transform_3, window_bounds = array<i64: 64, 16>}, {pipeline_mode = #tpu.pipeline_mode<synchronous>, transform_indices = @transform_4, window_bounds = array<i64: 1, 16>}, {transform_indices = @transform_5, window_bounds = array<i64: 256, 16>}]} {
    %c0 = arith.constant 0 : index
    %c0_0 = arith.constant 0 : index
    %0 = vector.load %arg1[%c0, %c0_0] : memref<256x32xf32, #tpu.memory_space<vmem>>, vector<256x32xf32>
    %c0_1 = arith.constant 0 : index
    %c0_2 = arith.constant 0 : index
    %1 = vector.load %arg2[%c0_1, %c0_2] : memref<32x64xf32, #tpu.memory_space<vmem>>, vector<32x64xf32>
    %cst = arith.constant dense<0.000000e+00> : vector<256x64xf32>
    %2 = tpu.matmul %0, %1, %cst {dimension_numbers = #tpu.dot_dimension_numbers<[1], [0], [0], [1], [0, 0, 1, 1], [], []>} : vector<256x32xf32>, vector<32x64xf32>, vector<256x64xf32> -> vector<256x64xf32>
    %c0_3 = arith.constant 0 : index
    %c0_4 = arith.constant 0 : index
    %3 = vector.load %arg3[%c0_3, %c0_4] : memref<1x64xf32, #tpu.memory_space<vmem>>, vector<1x64xf32>
    %4 = vector.broadcast %3 : vector<1x64xf32> to vector<256x64xf32>
    %5 = arith.addf %2, %4 : vector<256x64xf32>
    %cst_5 = arith.constant 0.000000e+00 : f32
    %6 = vector.broadcast %cst_5 : f32 to vector<256x64xf32>
    %7 = arith.maximumf %5, %6 : vector<256x64xf32>
    %c0_6 = arith.constant 0 : index
    %c0_7 = arith.constant 0 : index
    %8 = vector.load %arg4[%c0_6, %c0_7] : memref<64x16xf32, #tpu.memory_space<vmem>>, vector<64x16xf32>
    %cst_8 = arith.constant dense<0.000000e+00> : vector<256x16xf32>
    %9 = tpu.matmul %7, %8, %cst_8 {dimension_numbers = #tpu.dot_dimension_numbers<[1], [0], [0], [1], [0, 0, 1, 1], [], []>} : vector<256x64xf32>, vector<64x16xf32>, vector<256x16xf32> -> vector<256x16xf32>
    %c0_9 = arith.constant 0 : index
    %c0_10 = arith.constant 0 : index
    %10 = vector.load %arg5[%c0_9, %c0_10] : memref<1x16xf32, #tpu.memory_space<vmem>>, vector<1x16xf32>
    %11 = vector.broadcast %10 : vector<1x16xf32> to vector<256x16xf32>
    %12 = arith.addf %9, %11 : vector<256x16xf32>
    %c0_11 = arith.constant 0 : index
    %c0_12 = arith.constant 0 : index
    %13 = vector.load %arg6[%c0_11, %c0_12] : memref<256x16xf32, #tpu.memory_space<vmem>>, vector<256x16xf32>
    tpu.vector_store %arg6[%c0_11, %c0_12], %12 {strides = array<i32>} : memref<256x16xf32, #tpu.memory_space<vmem>>, vector<256x16xf32>,
    return
  }
  func.func @transform_0(%arg0: i32) -> (i32, i32) {
    %c0_i32 = arith.constant 0 : i32
    %c0_i32_0 = arith.constant 0 : i32
    return %arg0, %c0_i32 : i32, i32
  }
  func.func @transform_1(%arg0: i32) -> (i32, i32) {
    %c0_i32 = arith.constant 0 : i32
    %c0_i32_0 = arith.constant 0 : i32
    %c0_i32_1 = arith.constant 0 : i32
    return %c0_i32, %c0_i32_0 : i32, i32
  }
  func.func @transform_2(%arg0: i32) -> (i32, i32) {
    %c0_i32 = arith.constant 0 : i32
    %c0_i32_0 = arith.constant 0 : i32
    %c0_i32_1 = arith.constant 0 : i32
    return %c0_i32, %c0_i32_0 : i32, i32
  }
  func.func @transform_3(%arg0: i32) -> (i32, i32) {
    %c0_i32 = arith.constant 0 : i32
    %c0_i32_0 = arith.constant 0 : i32
    %c0_i32_1 = arith.constant 0 : i32
    return %c0_i32, %c0_i32_0 : i32, i32
  }
  func.func @transform_4(%arg0: i32) -> (i32, i32) {
    %c0_i32 = arith.constant 0 : i32
    %c0_i32_0 = arith.constant 0 : i32
    %c0_i32_1 = arith.constant 0 : i32
    return %c0_i32, %c0_i32_0 : i32, i32
  }
  func.func @transform_5(%arg0: i32) -> (i32, i32) {
    %c0_i32 = arith.constant 0 : i32
    %c0_i32_0 = arith.constant 0 : i32
    return %arg0, %c0_i32 : i32, i32
  }
}

</mosaic_0001>

<bundles_post_ra>
// kernel: tpu_custom_call.1
= control target key start
LH: loop header
LB: loop body
LE: loop exit
PB: predicated region body
PF: predicated region fallthrough
CT: control target
= control target key end

     0   :  { %vm60_vm0 = vcmask 261120   ;;  %vm314_vm1 = vcmask 523264   ;;  %vm524_vm2 = vcmask 130048   ;;  %s1067_s1 = inlined_call_operand.vmem [shape: f32[32,64], index: 1, kind: input, shape index: {}]   ;;  %s1068_s0 = inlined_call_operand.vmem [shape: f32[256,32], index: 0, kind: input, shape index: {}]   ;;  %s1069_s2 = inlined_call_operand.vmem [shape: f32[1,64], index: 2, kind: input, shape index: {}]   ;;  %s1070_s3 = inlined_call_operand.vmem [shape: f32[64,16], index: 3, kind: input, shape index: {}]   ;;  %s1071_s4 = inlined_call_operand.vmem [shape: f32[1,16], index: 4, kind: input, shape index: {}]   ;;  %s1072_s5 = inlined_call_operand.vmem [shape: f32[256,16], index: 5, kind: output, shape index: {}]  }
   0x1   :  { %v55_v0 = vld [vmem:[%s1067_s1 + $0x18] sm:$0xff]  ;;  %v54_v1 = vld [vmem:[%s1067_s1 + $0x10] sm:$0xff]  ;;  %v53_v2 = vld [vmem:[%s1067_s1 + $0x8] sm:$0xff] }
   0x2   :  { %169 = vmatpush.msra.mxu0 %v55_v0  ;;  %625 = vmatpush.msra.mxu3 %v55_v0  ;;  %v52_v3 = vld [vmem:[%s1067_s1] sm:$0xff]  ;;  %v21_v5 = vld [vmem:[%s1068_s0 + $0x8] sm:$0xff]  ;;  %v22_v6 = vld [vmem:[%s1068_s0 + $0x10] sm:$0xff] }
   0x3   :  { %v20_v4 = vld [vmem:[%s1068_s0] sm:$0xff]  ;;  %v23_v7 = vld [vmem:[%s1068_s0 + $0x18] sm:$0xff]  ;;  %v25_v9 = vld [vmem:[%s1068_s0 + $0x28] sm:$0xff] }
   0x4   :  { %170 = vmatpush.msra.mxu0 %v54_v1  ;;  %626 = vmatpush.msra.mxu3 %v54_v1  ;;  %v24_v8 = vld [vmem:[%s1068_s0 + $0x20] sm:$0xff]  ;;  %v26_v10 = vld [vmem:[%s1068_s0 + $0x30] sm:$0xff]  ;;  %v27_v11 = vld [vmem:[%s1068_s0 + $0x38] sm:$0xff] }
   0x5   :  { %v28_v12 = vld [vmem:[%s1068_s0 + $0x40] sm:$0xff]  ;;  %v29_v13 = vld [vmem:[%s1068_s0 + $0x48] sm:$0xff]  ;;  %v30_v14 = vld [vmem:[%s1068_s0 + $0x50] sm:$0xff] }
   0x6   :  { %171 = vmatpush.msra.mxu0 %v53_v2  ;;  %627 = vmatpush.msra.mxu3 %v53_v2  ;;  %v309_v15 = vld [vmem:[%s1070_s3 + $0x38] sm:$0xff]  ;;  %v308_v16 = vld [vmem:[%s1070_s3 + $0x30] sm:$0xff]  ;;  %v307_v17 = vld [vmem:[%s1070_s3 + $0x28] sm:$0xff] }
   0x7   :  { %419 = vmatpush.msra.mxu1 %v309_v15  ;;  %629 = vmatpush.msra.mxu2 %v309_v15  ;;  %v31_v18 = vld [vmem:[%s1068_s0 + $0x58] sm:$0xff]  ;;  %v306_v19 = vld [vmem:[%s1070_s3 + $0x20] sm:$0xff]  ;;  %v304_v21 = vld [vmem:[%s1070_s3 + $0x10] sm:$0xff] }
   0x8   :  { %172 = vmatpush.msra.mxu0 %v52_v3  ;;  %628 = vmatpush.msra.mxu3 %v52_v3  ;;  %v305_v20 = vld [vmem:[%s1070_s3 + $0x18] sm:$0xff]  ;;  %v32_v22 = vld [vmem:[%s1068_s0 + $0x60] sm:$0xff]  ;;  %v303_v23 = vld [vmem:[%s1070_s3 + $0x8] sm:$0xff] }
   0x9   :  { %561 = vmatmul.msk.f32.vlgmr.msra.gmra.mxu0 %vm60_vm0, %v20_v4  ;;  %420 = vmatpush.msra.mxu1 %v308_v16  ;;  %v302_v24 = vld [vmem:[%s1070_s3] sm:$0xff]  ;;  %v37_v25 = vld [vmem:[%s1068_s0 + $0x88] sm:$0xff]  ;;  %v38_v27 = vld [vmem:[%s1068_s0 + $0x90] sm:$0xff] }
   0xa   :  { %630 = vmatpush.msra.mxu2 %v308_v16  ;;  %578 = vmatmul.msk.f32.vlgmr.msra.gmra.mxu3 %vm60_vm0, %v37_v25  ;;  %v33_v26 = vld [vmem:[%s1068_s0 + $0x68] sm:$0xff]  ;;  %v34_v28 = vld [vmem:[%s1068_s0 + $0x70] sm:$0xff]  ;;  %v39_v29 = vld [vmem:[%s1068_s0 + $0x98] sm:$0xff] }
   0xb   :  { %421 = vmatpush.msra.mxu1 %v307_v17  ;;  %v35_v30 = vld [vmem:[%s1068_s0 + $0x78] sm:$0xff]  ;;  %v40_v31 = vld [vmem:[%s1068_s0 + $0xa0] sm:$0xff]  ;;  %v41_v37 = vld [vmem:[%s1068_s0 + $0xa8] sm:$0xff] }
   0xc   :  { %631 = vmatpush.msra.mxu2 %v307_v17  ;;  %v788_v32 = vld [vmem:[%s1069_s2] ss:$0 sm:$0xff]  ;;  %v42_v41 = vld [vmem:[%s1068_s0 + $0xb0] sm:$0xff]  ;;  %v43_v45 = vld [vmem:[%s1068_s0 + $0xb8] sm:$0xff] }
   0xd   :  { %422 = vmatpush.msra.mxu1 %v306_v19  ;;  %v36_v34 = vld [vmem:[%s1068_s0 + $0x80] sm:$0xff]  ;;  %v45_v53 = vld [vmem:[%s1068_s0 + $0xc8] sm:$0xff]  ;;  %v46_v57 = vld [vmem:[%s1068_s0 + $0xd0] sm:$0xff] }
   0xe   :  { %632 = vmatpush.msra.mxu2 %v306_v19  ;;  %v44_v49 = vld [vmem:[%s1068_s0 + $0xc0] sm:$0xff]  ;;  %v47_v61 = vld [vmem:[%s1068_s0 + $0xd8] sm:$0xff] }
   0xf   :  { %423 = vmatpush.msra.mxu1 %v305_v20  ;;  %v48_v1 = vld [vmem:[%s1068_s0 + $0xe0] sm:$0xff] }
  0x10   :  { %633 = vmatpush.msra.mxu2 %v305_v20 }
  0x11   :  { %562 = vmatmul.msk.f32.gmra.mxu0 %vm60_vm0, %v21_v5  ;;  %424 = vmatpush.msra.mxu1 %v304_v21  ;;  %v49_v5 = vld [vmem:[%s1068_s0 + $0xe8] sm:$0xff] }
  0x12   :  { %634 = vmatpush.msra.mxu2 %v304_v21  ;;  %579 = vmatmul.msk.f32.gmra.mxu3 %vm60_vm0, %v38_v27 }
  0x13   :  { %425 = vmatpush.msra.mxu1 %v303_v23 }
  0x14   :  { %635 = vmatpush.msra.mxu2 %v303_v23 }
  0x15   :  { %426 = vmatpush.msra.mxu1 %v302_v24 }
  0x16   :  { %636 = vmatpush.msra.mxu2 %v302_v24 }
  0x19   :  { %563 = vmatmul.msk.f32.gmra.mxu0 %vm60_vm0, %v22_v6 }
  0x1a   :  { %580 = vmatmul.msk.f32.gmra.mxu3 %vm60_vm0, %v39_v29 }
  0x21   :  { %564 = vmatmul.msk.f32.gmra.mxu0 %vm60_vm0, %v23_v7 }
  0x22   :  { %581 = vmatmul.msk.f32.gmra.mxu3 %vm60_vm0, %v40_v31 }
  0x29   :  { %565 = vmatmul.msk.f32.gmra.mxu0 %vm60_vm0, %v24_v8 }
  0x2a   :  { %582 = vmatmul.msk.f32.gmra.mxu3 %vm60_vm0, %v41_v37 }
  0x31   :  { %566 = vmatmul.msk.f32.gmra.mxu0 %vm60_vm0, %v25_v9  ;;  %v50_v9 = vld [vmem:[%s1068_s0 + $0xf0] sm:$0xff] }
  0x32   :  { %583 = vmatmul.msk.f32.gmra.mxu3 %vm60_vm0, %v42_v41 }
  0x39   :  { %567 = vmatmul.msk.f32.gmra.mxu0 %vm60_vm0, %v26_v10 }
  0x3a   :  { %584 = vmatmul.msk.f32.gmra.mxu3 %vm60_vm0, %v43_v45 }
  0x41   :  { %568 = vmatmul.msk.f32.gmra.mxu0 %vm60_vm0, %v27_v11 }
  0x42   :  { %585 = vmatmul.msk.f32.gmra.mxu3 %vm60_vm0, %v44_v49 }
  0x49   :  { %569 = vmatmul.msk.f32.gmra.mxu0 %vm60_vm0, %v28_v12 }
  0x4a   :  { %586 = vmatmul.msk.f32.gmra.mxu3 %vm60_vm0, %v45_v53 }
  0x51   :  { %570 = vmatmul.msk.f32.gmra.mxu0 %vm60_vm0, %v29_v13  ;;  %v51_v13 = vld [vmem:[%s1068_s0 + $0xf8] sm:$0xff] }
  0x52   :  { %587 = vmatmul.msk.f32.gmra.mxu3 %vm60_vm0, %v46_v57 }
  0x59   :  { %571 = vmatmul.msk.f32.gmra.mxu0 %vm60_vm0, %v30_v14 }
  0x5a   :  { %588 = vmatmul.msk.f32.gmra.mxu3 %vm60_vm0, %v47_v61 }
  0x61   :  { %572 = vmatmul.msk.f32.gmra.mxu0 %vm60_vm0, %v31_v18 }
  0x62   :  { %589 = vmatmul.msk.f32.gmra.mxu3 %vm60_vm0, %v48_v1 }
  0x69   :  { %573 = vmatmul.msk.f32.gmra.mxu0 %vm60_vm0, %v32_v22 }
  0x6a   :  { %590 = vmatmul.msk.f32.gmra.mxu3 %vm60_vm0, %v49_v5 }
  0x71   :  { %574 = vmatmul.msk.f32.gmra.mxu0 %vm60_vm0, %v33_v26 }
  0x72   :  { %591 = vmatmul.msk.f32.gmra.mxu3 %vm60_vm0, %v50_v9 }
  0x79   :  { %575 = vmatmul.msk.f32.gmra.mxu0 %vm60_vm0, %v34_v28 }
  0x7a   :  { %592 = vmatmul.msk.f32.gmra.mxu3 %vm60_vm0, %v51_v13 }
  0x81   :  { %576 = vmatmul.msk.f32.gmra.mxu0 %vm60_vm0, %v35_v30 }
  0x86   :  { %v174_v33 = vpop.f32.mrf.mxu0 }
  0x87   :  { %v175_v35 = vadd.f32 %v788_v32, %v174_v33  ;;  %v873_v33 = vld [vmem:[%s1071_s4] ss:$0 sm:$0xff] }
  0x89   :  { %v270_v36 = vmax.f32 %v175_v35, 0.0  ;;  %577 = vmatmul.msk.f32.gmra.mxu0 %vm60_vm0, %v36_v34 }
  0x8b   :  { %593 = vmatmul.msk.f32.vlgmr.msra.gmra.mxu1 %vm314_vm1, %v270_v36 }
  0x8d   :  { %v225_v20 = vpop.f32.mrf.mxu3 }
  0x8e   :  { %v177_v38 = vpop.f32.mrf.mxu0 }
  0x8f   :  { %v178_v39 = vadd.f32 %v788_v32, %v177_v38 }
  0x91   :  { %v271_v40 = vmax.f32 %v178_v39, 0.0 }
  0x93   :  { %594 = vmatmul.msk.f32.gmra.mxu1 %vm314_vm1, %v271_v40  ;;  %v226_v40 = vadd.f32 %v788_v32, %v225_v20 }
  0x95   :  { %v228_v25 = vpop.f32.mrf.mxu3  ;;  %v287_v41 = vmax.f32 %v226_v40, 0.0 }
  0x96   :  { %v180_v42 = vpop.f32.mrf.mxu0 }
  0x97   :  { %v181_v43 = vadd.f32 %v788_v32, %v180_v42 }
  0x99   :  { %v272_v44 = vmax.f32 %v181_v43, 0.0 }
  0x9b   :  { %595 = vmatmul.msk.f32.gmra.mxu1 %vm314_vm1, %v272_v44  ;;  %v229_v44 = vadd.f32 %v788_v32, %v228_v25 }
  0x9d   :  { %v231_v30 = vpop.f32.mrf.mxu3 }
  0x9e   :  { %v183_v46 = vpop.f32.mrf.mxu0  ;;  %v232_v49 = vadd.f32 %v788_v32, %v231_v30 }
  0x9f   :  { %v184_v47 = vadd.f32 %v788_v32, %v183_v46  ;;  %v288_v46 = vmax.f32 %v229_v44, 0.0 }
  0xa1   :  { %v273_v48 = vmax.f32 %v184_v47, 0.0 }
  0xa3   :  { %596 = vmatmul.msk.f32.gmra.mxu1 %vm314_vm1, %v273_v48 }
  0xa5   :  { %v234_v39 = vpop.f32.mrf.mxu3 }
  0xa6   :  { %v186_v50 = vpop.f32.mrf.mxu0 }
  0xa7   :  { %v187_v51 = vadd.f32 %v788_v32, %v186_v50 }
  0xa9   :  { %v274_v52 = vmax.f32 %v187_v51, 0.0  ;;  %v289_v51 = vmax.f32 %v232_v49, 0.0 }
  0xab   :  { %597 = vmatmul.msk.f32.gmra.mxu1 %vm314_vm1, %v274_v52 }
  0xad   :  { %v237_v45 = vpop.f32.mrf.mxu3 }
  0xae   :  { %v189_v54 = vpop.f32.mrf.mxu0 }
  0xaf   :  { %v190_v55 = vadd.f32 %v788_v32, %v189_v54  ;;  %v235_v54 = vadd.f32 %v788_v32, %v234_v39 }
  0xb1   :  { %v275_v56 = vmax.f32 %v190_v55, 0.0  ;;  %v290_v55 = vmax.f32 %v235_v54, 0.0 }
  0xb3   :  { %598 = vmatmul.msk.f32.gmra.mxu1 %vm314_vm1, %v275_v56 }
  0xb5   :  { %v240_v50 = vpop.f32.mrf.mxu3 }
  0xb6   :  { %v192_v58 = vpop.f32.mrf.mxu0 }
  0xb7   :  { %v193_v59 = vadd.f32 %v788_v32, %v192_v58 }
  0xb9   :  { %v276_v60 = vmax.f32 %v193_v59, 0.0  ;;  %v238_v59 = vadd.f32 %v788_v32, %v237_v45 }
  0xbb   :  { %599 = vmatmul.msk.f32.gmra.mxu1 %vm314_vm1, %v276_v60  ;;  %v291_v60 = vmax.f32 %v238_v59, 0.0 }
  0xbd   :  { %v243_v57 = vpop.f32.mrf.mxu3 }
  0xbe   :  { %v195_v62 = vpop.f32.mrf.mxu0 }
  0xbf   :  { %v196_v63 = vadd.f32 %v788_v32, %v195_v62 }
  0xc1   :  { %v277_v0 = vmax.f32 %v196_v63, 0.0 }
  0xc3   :  { %600 = vmatmul.msk.f32.gmra.mxu1 %vm314_vm1, %v277_v0  ;;  %v241_v0 = vadd.f32 %v788_v32, %v240_v50 }
  0xc5   :  { %v246_v63 = vpop.f32.mrf.mxu3  ;;  %v292_v1 = vmax.f32 %v241_v0, 0.0 }
  0xc6   :  { %v198_v2 = vpop.f32.mrf.mxu0  ;;  %v247_v9 = vadd.f32 %v788_v32, %v246_v63 }
  0xc7   :  { %v199_v3 = vadd.f32 %v788_v32, %v198_v2 }
  0xc9   :  { %v278_v4 = vmax.f32 %v199_v3, 0.0 }
  0xcb   :  { %601 = vmatmul.msk.f32.gmra.mxu1 %vm314_vm1, %v278_v4  ;;  %v244_v4 = vadd.f32 %v788_v32, %v243_v57 }
  0xcd   :  { %v249_v5 = vpop.f32.mrf.mxu3 }
  0xce   :  { %v201_v6 = vpop.f32.mrf.mxu0 }
  0xcf   :  { %v202_v7 = vadd.f32 %v788_v32, %v201_v6  ;;  %v293_v6 = vmax.f32 %v244_v4, 0.0 }
  0xd1   :  { %v279_v8 = vmax.f32 %v202_v7, 0.0 }
  0xd3   :  { %602 = vmatmul.msk.f32.gmra.mxu1 %vm314_vm1, %v279_v8 }
  0xd6   :  { %v204_v10 = vpop.f32.mrf.mxu0 }
  0xd7   :  { %v205_v11 = vadd.f32 %v788_v32, %v204_v10  ;;  %v252_v10 = vpop.f32.mrf.mxu3 }
  0xd9   :  { %v280_v12 = vmax.f32 %v205_v11, 0.0  ;;  %v294_v11 = vmax.f32 %v247_v9, 0.0 }
  0xdb   :  { %603 = vmatmul.msk.f32.gmra.mxu1 %vm314_vm1, %v280_v12 }
  0xde   :  { %v207_v14 = vpop.f32.mrf.mxu0 }
  0xdf   :  { %v208_v15 = vadd.f32 %v788_v32, %v207_v14  ;;  %v250_v14 = vadd.f32 %v788_v32, %v249_v5 }
  0xe1   :  { %v281_v16 = vmax.f32 %v208_v15, 0.0  ;;  %v295_v15 = vmax.f32 %v250_v14, 0.0 }
  0xe3   :  { %604 = vmatmul.msk.f32.gmra.mxu1 %vm314_vm1, %v281_v16 }
  0xe6   :  { %v210_v17 = vpop.f32.mrf.mxu0 }
  0xe7   :  { %v211_v18 = vadd.f32 %v788_v32, %v210_v17  ;;  %v255_v17 = vpop.f32.mrf.mxu3 }
  0xe9   :  { %v282_v19 = vmax.f32 %v211_v18, 0.0 }
  0xeb   :  { %605 = vmatmul.msk.f32.gmra.mxu1 %vm314_vm1, %v282_v19  ;;  %v253_v19 = vadd.f32 %v788_v32, %v252_v10 }
  0xed   :  { %v296_v20 = vmax.f32 %v253_v19, 0.0 }
  0xee   :  { %v213_v21 = vpop.f32.mrf.mxu0 }
  0xef   :  { %v214_v22 = vadd.f32 %v788_v32, %v213_v21 }
  0xf1   :  { %v283_v23 = vmax.f32 %v214_v22, 0.0 }
  0xf3   :  { %606 = vmatmul.msk.f32.gmra.mxu1 %vm314_vm1, %v283_v23  ;;  %v258_v23 = vpop.f32.mrf.mxu3 }
  0xf6   :  { %v216_v24 = vpop.f32.mrf.mxu0 }
  0xf7   :  { %v217_v26 = vadd.f32 %v788_v32, %v216_v24  ;;  %v256_v24 = vadd.f32 %v788_v32, %v255_v17 }
  0xf9   :  { %v284_v27 = vmax.f32 %v217_v26, 0.0  ;;  %v297_v25 = vmax.f32 %v256_v24, 0.0 }
  0xfb   :  { %607 = vmatmul.msk.f32.gmra.mxu1 %vm314_vm1, %v284_v27 }
  0xfe   :  { %v219_v28 = vpop.f32.mrf.mxu0 }
  0xff   :  { %v220_v29 = vadd.f32 %v788_v32, %v219_v28  ;;  %v259_v28 = vadd.f32 %v788_v32, %v258_v23 }
 0x101   :  { %v285_v31 = vmax.f32 %v220_v29, 0.0  ;;  %v261_v29 = vpop.f32.mrf.mxu3  ;;  %v298_v30 = vmax.f32 %v259_v28, 0.0 }
 0x103   :  { %608 = vmatmul.msk.f32.gmra.mxu1 %vm314_vm1, %v285_v31 }
 0x106   :  { %v222_v34 = vpop.f32.mrf.mxu0 }
 0x107   :  { %v223_v35 = vadd.f32 %v788_v32, %v222_v34 }
 0x108   :  { %v428_v36 = vpop.f32.mrf.mxu1 }
 0x109   :  { %v286_v37 = vmax.f32 %v223_v35, 0.0  ;;  %v429_v38 = vadd.f32 %v873_v33, %v428_v36  ;;  %v262_v35 = vadd.f32 %v788_v32, %v261_v29  ;;  %v264_v36 = vpop.f32.mrf.mxu3 }
 0x10a   :  { %v265_v40 = vadd.f32 %v788_v32, %v264_v36 }
 0x10b   :  { %525 = vst.msk [vmem:[%s1072_s5] sm:$0xff] %vm524_vm2, %v429_v38  ;;  %609 = vmatmul.msk.f32.vlgmr.msra.gmra.mxu2 %vm314_vm1, %v286_v37  ;;  %v299_v37 = vmax.f32 %v262_v35, 0.0 }
 0x110   :  { %v431_v42 = vpop.f32.mrf.mxu1 }
 0x111   :  { %v432_v43 = vadd.f32 %v873_v33, %v431_v42 }
 0x113   :  { %526 = vst.msk [vmem:[%s1072_s5 + $0x8] sm:$0xff] %vm524_vm2, %v432_v43  ;;  %610 = vmatmul.msk.f32.gmra.mxu2 %vm314_vm1, %v287_v41  ;;  %v300_v41 = vmax.f32 %v265_v40, 0.0  ;;  %v267_v43 = vpop.f32.mrf.mxu3 }
 0x114   :  { %v268_v45 = vadd.f32 %v788_v32, %v267_v43 }
 0x118   :  { %v434_v47 = vpop.f32.mrf.mxu1 }
 0x119   :  { %v435_v48 = vadd.f32 %v873_v33, %v434_v47 }
 0x11b   :  { %527 = vst.msk [vmem:[%s1072_s5 + $0x10] sm:$0xff] %vm524_vm2, %v435_v48  ;;  %611 = vmatmul.msk.f32.gmra.mxu2 %vm314_vm1, %v288_v46  ;;  %v301_v46 = vmax.f32 %v268_v45, 0.0 }
 0x120   :  { %v437_v52 = vpop.f32.mrf.mxu1 }
 0x121   :  { %v438_v53 = vadd.f32 %v873_v33, %v437_v52 }
 0x123   :  { %528 = vst.msk [vmem:[%s1072_s5 + $0x18] sm:$0xff] %vm524_vm2, %v438_v53  ;;  %612 = vmatmul.msk.f32.gmra.mxu2 %vm314_vm1, %v289_v51 }
 0x128   :  { %v440_v56 = vpop.f32.mrf.mxu1 }
 0x129   :  { %v441_v58 = vadd.f32 %v873_v33, %v440_v56 }
 0x12b   :  { %529 = vst.msk [vmem:[%s1072_s5 + $0x20] sm:$0xff] %vm524_vm2, %v441_v58  ;;  %613 = vmatmul.msk.f32.gmra.mxu2 %vm314_vm1, %v290_v55 }
 0x130   :  { %v443_v61 = vpop.f32.mrf.mxu1 }
 0x131   :  { %v444_v62 = vadd.f32 %v873_v33, %v443_v61 }
 0x133   :  { %530 = vst.msk [vmem:[%s1072_s5 + $0x28] sm:$0xff] %vm524_vm2, %v444_v62  ;;  %614 = vmatmul.msk.f32.gmra.mxu2 %vm314_vm1, %v291_v60 }
 0x138   :  { %v446_v2 = vpop.f32.mrf.mxu1 }
 0x139   :  { %v447_v3 = vadd.f32 %v873_v33, %v446_v2 }
 0x13b   :  { %531 = vst.msk [vmem:[%s1072_s5 + $0x30] sm:$0xff] %vm524_vm2, %v447_v3  ;;  %615 = vmatmul.msk.f32.gmra.mxu2 %vm314_vm1, %v292_v1 }
 0x140   :  { %v449_v7 = vpop.f32.mrf.mxu1 }
 0x141   :  { %v450_v8 = vadd.f32 %v873_v33, %v449_v7 }
 0x143   :  { %532 = vst.msk [vmem:[%s1072_s5 + $0x38] sm:$0xff] %vm524_vm2, %v450_v8  ;;  %616 = vmatmul.msk.f32.gmra.mxu2 %vm314_vm1, %v293_v6 }
 0x148   :  { %v452_v12 = vpop.f32.mrf.mxu1 }
 0x149   :  { %v453_v13 = vadd.f32 %v873_v33, %v452_v12 }
 0x14b   :  { %533 = vst.msk [vmem:[%s1072_s5 + $0x40] sm:$0xff] %vm524_vm2, %v453_v13  ;;  %617 = vmatmul.msk.f32.gmra.mxu2 %vm314_vm1, %v294_v11 }
 0x150   :  { %v455_v16 = vpop.f32.mrf.mxu1 }
 0x151   :  { %v456_v18 = vadd.f32 %v873_v33, %v455_v16 }
 0x153   :  { %534 = vst.msk [vmem:[%s1072_s5 + $0x48] sm:$0xff] %vm524_vm2, %v456_v18  ;;  %618 = vmatmul.msk.f32.gmra.mxu2 %vm314_vm1, %v295_v15 }
 0x158   :  { %v458_v21 = vpop.f32.mrf.mxu1 }
 0x159   :  { %v459_v22 = vadd.f32 %v873_v33, %v458_v21 }
 0x15b   :  { %535 = vst.msk [vmem:[%s1072_s5 + $0x50] sm:$0xff] %vm524_vm2, %v459_v22  ;;  %619 = vmatmul.msk.f32.gmra.mxu2 %vm314_vm1, %v296_v20 }
 0x160   :  { %v461_v26 = vpop.f32.mrf.mxu1 }
 0x161   :  { %v462_v27 = vadd.f32 %v873_v33, %v461_v26 }
 0x163   :  { %536 = vst.msk [vmem:[%s1072_s5 + $0x58] sm:$0xff] %vm524_vm2, %v462_v27  ;;  %620 = vmatmul.msk.f32.gmra.mxu2 %vm314_vm1, %v297_v25 }
 0x168   :  { %v464_v31 = vpop.f32.mrf.mxu1 }
 0x169   :  { %v465_v34 = vadd.f32 %v873_v33, %v464_v31 }
 0x16b   :  { %537 = vst.msk [vmem:[%s1072_s5 + $0x60] sm:$0xff] %vm524_vm2, %v465_v34  ;;  %621 = vmatmul.msk.f32.gmra.mxu2 %vm314_vm1, %v298_v30 }
 0x170   :  { %v467_v38 = vpop.f32.mrf.mxu1 }
 0x171   :  { %v468_v39 = vadd.f32 %v873_v33, %v467_v38 }
 0x173   :  { %538 = vst.msk [vmem:[%s1072_s5 + $0x68] sm:$0xff] %vm524_vm2, %v468_v39  ;;  %622 = vmatmul.msk.f32.gmra.mxu2 %vm314_vm1, %v299_v37 }
 0x178   :  { %v470_v42 = vpop.f32.mrf.mxu1 }
 0x179   :  { %v471_v44 = vadd.f32 %v873_v33, %v470_v42 }
 0x17b   :  { %539 = vst.msk [vmem:[%s1072_s5 + $0x70] sm:$0xff] %vm524_vm2, %v471_v44  ;;  %623 = vmatmul.msk.f32.gmra.mxu2 %vm314_vm1, %v300_v41 }
 0x180   :  { %v473_v47 = vpop.f32.mrf.mxu1 }
 0x181   :  { %v474_v48 = vadd.f32 %v873_v33, %v473_v47 }
 0x183   :  { %540 = vst.msk [vmem:[%s1072_s5 + $0x78] sm:$0xff] %vm524_vm2, %v474_v48  ;;  %624 = vmatmul.msk.f32.gmra.mxu2 %vm314_vm1, %v301_v46 }
 0x18e   :  { %v476_v49 = vpop.f32.mrf.mxu2 }
 0x18f   :  { %v477_v50 = vadd.f32 %v873_v33, %v476_v49 }
 0x191   :  { %541 = vst.msk [vmem:[%s1072_s5 + $0x80] sm:$0xff] %vm524_vm2, %v477_v50 }
 0x196   :  { %v479_v32 = vpop.f32.mrf.mxu2 }
 0x197   :  { %v480_v51 = vadd.f32 %v873_v33, %v479_v32 }
 0x199   :  { %542 = vst.msk [vmem:[%s1072_s5 + $0x88] sm:$0xff] %vm524_vm2, %v480_v51 }
 0x19e   :  { %v482_v52 = vpop.f32.mrf.mxu2 }
 0x19f   :  { %v483_v53 = vadd.f32 %v873_v33, %v482_v52 }
 0x1a1   :  { %543 = vst.msk [vmem:[%s1072_s5 + $0x90] sm:$0xff] %vm524_vm2, %v483_v53 }
 0x1a6   :  { %v485_v54 = vpop.f32.mrf.mxu2 }
 0x1a7   :  { %v486_v55 = vadd.f32 %v873_v33, %v485_v54 }
 0x1a9   :  { %544 = vst.msk [vmem:[%s1072_s5 + $0x98] sm:$0xff] %vm524_vm2, %v486_v55 }
 0x1ae   :  { %v488_v56 = vpop.f32.mrf.mxu2 }
 0x1af   :  { %v489_v57 = vadd.f32 %v873_v33, %v488_v56 }
 0x1b1   :  { %545 = vst.msk [vmem:[%s1072_s5 + $0xa0] sm:$0xff] %vm524_vm2, %v489_v57 }
 0x1b6   :  { %v491_v58 = vpop.f32.mrf.mxu2 }
 0x1b7   :  { %v492_v59 = vadd.f32 %v873_v33, %v491_v58 }
 0x1b9   :  { %546 = vst.msk [vmem:[%s1072_s5 + $0xa8] sm:$0xff] %vm524_vm2, %v492_v59 }
 0x1be   :  { %v494_v60 = vpop.f32.mrf.mxu2 }
 0x1bf   :  { %v495_v61 = vadd.f32 %v873_v33, %v494_v60 }
 0x1c1   :  { %547 = vst.msk [vmem:[%s1072_s5 + $0xb0] sm:$0xff] %vm524_vm2, %v495_v61 }
 0x1c6   :  { %v497_v62 = vpop.f32.mrf.mxu2 }
 0x1c7   :  { %v498_v63 = vadd.f32 %v873_v33, %v497_v62 }
 0x1c9   :  { %548 = vst.msk [vmem:[%s1072_s5 + $0xb8] sm:$0xff] %vm524_vm2, %v498_v63 }
 0x1ce   :  { %v500_v0 = vpop.f32.mrf.mxu2 }
 0x1cf   :  { %v501_v1 = vadd.f32 %v873_v33, %v500_v0 }
 0x1d1   :  { %549 = vst.msk [vmem:[%s1072_s5 + $0xc0] sm:$0xff] %vm524_vm2, %v501_v1 }
 0x1d6   :  { %v503_v2 = vpop.f32.mrf.mxu2 }
 0x1d7   :  { %v504_v3 = vadd.f32 %v873_v33, %v503_v2 }
 0x1d9   :  { %550 = vst.msk [vmem:[%s1072_s5 + $0xc8] sm:$0xff] %vm524_vm2, %v504_v3 }
 0x1de   :  { %v506_v4 = vpop.f32.mrf.mxu2 }
 0x1df   :  { %v507_v5 = vadd.f32 %v873_v33, %v506_v4 }
 0x1e1   :  { %551 = vst.msk [vmem:[%s1072_s5 + $0xd0] sm:$0xff] %vm524_vm2, %v507_v5 }
 0x1e6   :  { %v509_v6 = vpop.f32.mrf.mxu2 }
 0x1e7   :  { %v510_v7 = vadd.f32 %v873_v33, %v509_v6 }
 0x1e9   :  { %552 = vst.msk [vmem:[%s1072_s5 + $0xd8] sm:$0xff] %vm524_vm2, %v510_v7 }
 0x1ee   :  { %v512_v8 = vpop.f32.mrf.mxu2 }
 0x1ef   :  { %v513_v9 = vadd.f32 %v873_v33, %v512_v8 }
 0x1f1   :  { %553 = vst.msk [vmem:[%s1072_s5 + $0xe0] sm:$0xff] %vm524_vm2, %v513_v9 }
 0x1f6   :  { %v515_v10 = vpop.f32.mrf.mxu2 }
 0x1f7   :  { %v516_v11 = vadd.f32 %v873_v33, %v515_v10 }
 0x1f9   :  { %554 = vst.msk [vmem:[%s1072_s5 + $0xe8] sm:$0xff] %vm524_vm2, %v516_v11 }
 0x1fe   :  { %v518_v12 = vpop.f32.mrf.mxu2 }
 0x1ff   :  { %v519_v13 = vadd.f32 %v873_v33, %v518_v12 }
 0x201   :  { %555 = vst.msk [vmem:[%s1072_s5 + $0xf0] sm:$0xff] %vm524_vm2, %v519_v13 }
 0x206   :  { %v521_v14 = vpop.f32.mrf.mxu2 }
 0x207   :  { %v522_v15 = vadd.f32 %v873_v33, %v521_v14 }
 0x209   :  { %556 = vst.msk [vmem:[%s1072_s5 + $0xf8] sm:$0xff] %vm524_vm2, %v522_v15 }

</bundles_post_ra>
